<compile_context>
chip_gen: v7x
topology: tpu7x:2x2x1
jax: 0.10.0
libtpu: 0.0.40
codegen_flags: <defaults>
</compile_context>

<pallas_src>
import jax
import jax.numpy as jnp
from jax.experimental import pallas as pl
from jax.experimental.pallas import tpu as pltpu

LANES = 128  # fused hidden width = one full vreg lane width


def _sigmoid(x):
    # single-EUP formulation: sigmoid(x) == 0.5 * tanh(0.5 * x) + 0.5
    return 0.5 * jnp.tanh(0.5 * x) + 0.5


def rnd_fused_kernel(x_ref, w1_ref, b1_ref, w2_ref, b2_ref, y_ref):
    """y = sigmoid( sigmoid(x @ W1 + b1) @ W2 + b2 )   (target+predictor fused)."""
    x = x_ref[...].astype(jnp.bfloat16)                       # MXU fast path
    h = jnp.dot(x, w1_ref[...], preferred_element_type=jnp.float32) + b1_ref[...]
    h = _sigmoid(h)                                           # f32 elementwise
    z = jnp.dot(h.astype(jnp.bfloat16), w2_ref[...],
                preferred_element_type=jnp.float32) + b2_ref[...]
    y_ref[...] = _sigmoid(z)


def fuse_params(params, k):
    """Fuse target+predictor weights into one zero-padded two-layer MLP.

    Fused hidden layout (128 lanes): [0:f3) target | [f3:2f3) predictor | pad.
    Fused output layout (2k lanes):  [0:k) target  | [k:2k) predictor.
    Zero rows in W2 cancel the sigmoid(0)=0.5 padded hidden lanes, so the
    fusion is exact.  Matmul operands are stored in bf16; biases stay f32
    (added after f32 accumulation).
    """
    state_dim, f3 = params["wt1"].shape
    w1 = jnp.zeros((state_dim, LANES), jnp.float32)
    w1 = w1.at[:, :f3].set(params["wt1"]).at[:, f3:2 * f3].set(params["wp1"])
    b1 = jnp.zeros((1, LANES), jnp.float32)
    b1 = b1.at[:, :f3].set(params["bt1"]).at[:, f3:2 * f3].set(params["bp1"])
    w2 = jnp.zeros((LANES, 2 * k), jnp.float32)
    w2 = w2.at[:f3, :k].set(params["wt2"]).at[f3:2 * f3, k:].set(params["wp2"])
    b2 = jnp.zeros((1, 2 * k), jnp.float32)
    b2 = b2.at[:, :k].set(params["bt2"]).at[:, k:].set(params["bp2"])
    return w1.astype(jnp.bfloat16), b1, w2.astype(jnp.bfloat16), b2


def _round_up(x, m):
    return ((x + m - 1) // m) * m


def _pick_tile(B, block_b):
    if B <= 64:
        return B                      # tiny batch: single full-extent tile
    # >= 2 tiles so v7x's second TensorCore gets work; cap at block_b.
    return min(block_b, _round_up(pl.cdiv(B, 2), 16))


def rnd_forward(xn, fused, k, *, block_b=4096):
    """Fused RND forward. xn: (B, state_dim) f32. Returns (to, po, mse)."""
    w1, b1, w2, b2 = fused
    B, state_dim = xn.shape
    out_dim = 2 * k

    tb = _pick_tile(B, block_b)
    grid = (pl.cdiv(B, tb),)          # boundary block masked by Pallas (no jnp.pad)

    cost = pl.CostEstimate(
        flops=2 * B * state_dim * LANES + 2 * B * LANES * out_dim,
        transcendentals=B * (LANES + out_dim),
        bytes_accessed=4 * B * (state_dim + out_dim)
        + 2 * (state_dim * LANES + LANES * out_dim) + 4 * (LANES + out_dim),
    )

    y = pl.pallas_call(
        rnd_fused_kernel,
        out_shape=jax.ShapeDtypeStruct((B, out_dim), jnp.float32),
        grid_spec=pl.GridSpec(
            grid=grid,
            in_specs=[
                pl.BlockSpec((tb, state_dim), lambda i: (i, 0)),      # x batch tile
                pl.BlockSpec((state_dim, LANES), lambda i: (0, 0)),   # W1 (resident)
                pl.BlockSpec((1, LANES), lambda i: (0, 0)),           # b1 (resident)
                pl.BlockSpec((LANES, out_dim), lambda i: (0, 0)),     # W2 (resident)
                pl.BlockSpec((1, out_dim), lambda i: (0, 0)),         # b2 (resident)
            ],
            out_specs=pl.BlockSpec((tb, out_dim), lambda i: (i, 0)),  # (B, 2k) slab
        ),
        compiler_params=pltpu.CompilerParams(
            dimension_semantics=("parallel",)),   # shard batch tiles across TCs
        cost_estimate=cost,
    )(xn, w1, b1, w2, b2)

    to = y[:, :k]
    po = y[:, k:]
    # mse = (to - po)^2 summed over batch, / 2  (matches the PyTorch module).
    mse = jnp.sum((to - po) ** 2, axis=0) * 0.5
    return to, po, mse


# --------------------------------------------------------------------------
# RunningMeanStdOne (output normalizer) — plain-JAX glue around the kernel.
# TODO(synk): RunningMeanStdOne's definition is not in the provided snippet;
# implemented the standard Welford running-stats update that returns the
# value normalized by the updated running std (common RND convention).
# TODO(synk): self.input_norm (RunningMeanStd) is never used in forward(), so
# it is not implemented here.
def running_mean_std_one_update(state, x):
    mean, var, count = state
    batch_mean = jnp.mean(x)
    batch_var = jnp.var(x)
    batch_count = x.size

    delta = batch_mean - mean
    tot = count + batch_count
    new_mean = mean + delta * batch_count / tot
    m_a = var * count
    m_b = batch_var * batch_count
    m2 = m_a + m_b + (delta ** 2) * count * batch_count / tot
    new_var = m2 / tot

    new_state = (new_mean, new_var, tot)
    int_reward = x / jnp.sqrt(new_var + 1e-8)
    return new_state, int_reward


def init_params(key, state_dim=16, f3=16, k=16):
    """Deterministic (Xavier-uniform-ish) init standing in for weights_init."""
    ks = jax.random.split(key, 8)

    def lin(kw, kb, fan_in, fan_out):
        bound = 1.0 / jnp.sqrt(jnp.float32(fan_in))
        w = jax.random.uniform(kw, (fan_in, fan_out), jnp.float32, -bound, bound)
        b = jax.random.uniform(kb, (1, fan_out), jnp.float32, -bound, bound)
        return w, b

    wt1, bt1 = lin(ks[0], ks[1], state_dim, f3)
    wt2, bt2 = lin(ks[2], ks[3], f3, k)
    wp1, bp1 = lin(ks[4], ks[5], state_dim, f3)
    wp2, bp2 = lin(ks[6], ks[7], f3, k)
    return dict(wt1=wt1, bt1=bt1, wt2=wt2, bt2=bt2,
                wp1=wp1, bp1=bp1, wp2=wp2, bp2=bp2)


def reference_forward(xn, params):
    """Pure-JAX f32 reference (unfused) mirroring the PyTorch module."""
    ht = jax.nn.sigmoid(xn @ params["wt1"] + params["bt1"])
    to = jax.nn.sigmoid(ht @ params["wt2"] + params["bt2"])
    hp = jax.nn.sigmoid(xn @ params["wp1"] + params["bp1"])
    po = jax.nn.sigmoid(hp @ params["wp2"] + params["bp2"])
    mse = jnp.sum((to - po) ** 2, axis=0) * 0.5
    return to, po, mse


if __name__ == "__main__":
    key = jax.random.PRNGKey(0)
    k_param, k_x1, k_x2, k_x3 = jax.random.split(key, 4)

    state_dim, f3, k_out = 16, 16, 16
    params = init_params(k_param, state_dim=state_dim, f3=f3, k=k_out)
    fused = fuse_params(params, k_out)

    # bf16 matmul operands => loosen tolerances (review's correctness note).
    TOL = 2e-2

    # --- small batch (single grid step), matches the module's native shapes ---
    xn = jax.random.normal(k_x1, (8, state_dim), jnp.float32)
    to, po, mse = rnd_forward(xn, fused, k_out)

    # output_norm.update(mse.unsqueeze(0)) -> intrinsic reward
    norm_state = (jnp.float32(0.0), jnp.float32(1.0), jnp.float32(1e-4))
    norm_state, int_reward = running_mean_std_one_update(norm_state, mse[None, :])
    jax.block_until_ready((to, po, int_reward))

    to_r, po_r, mse_r = reference_forward(xn, params)
    assert jnp.allclose(to, to_r, atol=TOL), "target output mismatch"
    assert jnp.allclose(po, po_r, atol=TOL), "predictor output mismatch"
    assert jnp.allclose(mse, mse_r, atol=TOL, rtol=TOL), "mse mismatch"

    # --- larger batch: exercises the 2-tile (megacore-parallel) path ---
    xn_big = jax.random.normal(k_x2, (2048, state_dim), jnp.float32)
    to_b, po_b, mse_b = rnd_forward(xn_big, fused, k_out)
    jax.block_until_ready((to_b, po_b, mse_b))

    to_br, po_br, mse_br = reference_forward(xn_big, params)
    assert jnp.allclose(to_b, to_br, atol=TOL), "tiled target mismatch"
    assert jnp.allclose(po_b, po_br, atol=TOL), "tiled predictor mismatch"
    assert jnp.allclose(mse_b, mse_br, rtol=0.1, atol=0.5), "tiled mse mismatch"

    # --- batch not a multiple of the tile: exercises the masked boundary block ---
    xn_odd = jax.random.normal(k_x3, (1000, state_dim), jnp.float32)
    to_o, po_o, mse_o = rnd_forward(xn_odd, fused, k_out)
    jax.block_until_ready((to_o, po_o, mse_o))

    to_or, po_or, mse_or = reference_forward(xn_odd, params)
    assert jnp.allclose(to_o, to_or, atol=TOL), "boundary target mismatch"
    assert jnp.allclose(po_o, po_or, atol=TOL), "boundary predictor mismatch"
    assert jnp.allclose(mse_o, mse_or, rtol=0.1, atol=0.5), "boundary mse mismatch"

    print("KERNEL_OK")
</pallas_src>

<mosaic_0001>
module attributes {stable_mosaic.version = 11 : i64} {
  func.func @rnd_fused_kernel(%arg0: i32, %arg1: memref<8x16xf32, #tpu.memory_space<vmem>>, %arg2: memref<16x128xbf16, #tpu.memory_space<vmem>>, %arg3: memref<1x128xf32, #tpu.memory_space<vmem>>, %arg4: memref<128x32xbf16, #tpu.memory_space<vmem>>, %arg5: memref<1x32xf32, #tpu.memory_space<vmem>>, %arg6: memref<8x32xf32, #tpu.memory_space<vmem>>) attributes {dimension_semantics = [#tpu.dimension_semantics<parallel>], iteration_bounds = array<i64: 1>, scalar_prefetch = 0 : i64, scratch_operands = 0 : i64, tpu.core_type = #tpu.core_type<tc>, window_params = [{transform_indices = @transform_0, window_bounds = array<i64: 8, 16>}, {pipeline_mode = #tpu.pipeline_mode<synchronous>, transform_indices = @transform_1, window_bounds = array<i64: 16, 128>}, {pipeline_mode = #tpu.pipeline_mode<synchronous>, transform_indices = @transform_2, window_bounds = array<i64: 1, 128>}, {pipeline_mode = #tpu.pipeline_mode<synchronous>, transform_indices = @transform_3, window_bounds = array<i64: 128, 32>}, {pipeline_mode = #tpu.pipeline_mode<synchronous>, transform_indices = @transform_4, window_bounds = array<i64: 1, 32>}, {transform_indices = @transform_5, window_bounds = array<i64: 8, 32>}]} {
    %c0 = arith.constant 0 : index
    %c0_0 = arith.constant 0 : index
    %0 = vector.load %arg1[%c0, %c0_0] : memref<8x16xf32, #tpu.memory_space<vmem>>, vector<8x16xf32>
    %1 = arith.truncf %0 : vector<8x16xf32> to vector<8x16xbf16>
    %c0_1 = arith.constant 0 : index
    %c0_2 = arith.constant 0 : index
    %2 = vector.load %arg2[%c0_1, %c0_2] : memref<16x128xbf16, #tpu.memory_space<vmem>>, vector<16x128xbf16>
    %cst = arith.constant dense<0.000000e+00> : vector<8x128xf32>
    %3 = tpu.matmul %1, %2, %cst {dimension_numbers = #tpu.dot_dimension_numbers<[1], [0], [0], [1], [0, 0, 1, 1], [], []>} : vector<8x16xbf16>, vector<16x128xbf16>, vector<8x128xf32> -> vector<8x128xf32>
    %c0_3 = arith.constant 0 : index
    %c0_4 = arith.constant 0 : index
    %4 = vector.load %arg3[%c0_3, %c0_4] : memref<1x128xf32, #tpu.memory_space<vmem>>, vector<1x128xf32>
    %5 = vector.broadcast %4 : vector<1x128xf32> to vector<8x128xf32>
    %6 = arith.addf %3, %5 : vector<8x128xf32>
    %cst_5 = arith.constant 5.000000e-01 : f32
    %7 = vector.broadcast %cst_5 : f32 to vector<8x128xf32>
    %8 = arith.mulf %7, %6 : vector<8x128xf32>
    %9 = math.tanh %8 : vector<8x128xf32>
    %cst_6 = arith.constant 5.000000e-01 : f32
    %10 = vector.broadcast %cst_6 : f32 to vector<8x128xf32>
    %11 = arith.mulf %10, %9 : vector<8x128xf32>
    %cst_7 = arith.constant 5.000000e-01 : f32
    %12 = vector.broadcast %cst_7 : f32 to vector<8x128xf32>
    %13 = arith.addf %11, %12 : vector<8x128xf32>
    %14 = arith.truncf %13 : vector<8x128xf32> to vector<8x128xbf16>
    %c0_8 = arith.constant 0 : index
    %c0_9 = arith.constant 0 : index
    %15 = vector.load %arg4[%c0_8, %c0_9] : memref<128x32xbf16, #tpu.memory_space<vmem>>, vector<128x32xbf16>
    %cst_10 = arith.constant dense<0.000000e+00> : vector<8x32xf32>
    %16 = tpu.matmul %14, %15, %cst_10 {dimension_numbers = #tpu.dot_dimension_numbers<[1], [0], [0], [1], [0, 0, 1, 1], [], []>} : vector<8x128xbf16>, vector<128x32xbf16>, vector<8x32xf32> -> vector<8x32xf32>
    %c0_11 = arith.constant 0 : index
    %c0_12 = arith.constant 0 : index
    %17 = vector.load %arg5[%c0_11, %c0_12] : memref<1x32xf32, #tpu.memory_space<vmem>>, vector<1x32xf32>
    %18 = vector.broadcast %17 : vector<1x32xf32> to vector<8x32xf32>
    %19 = arith.addf %16, %18 : vector<8x32xf32>
    %cst_13 = arith.constant 5.000000e-01 : f32
    %20 = vector.broadcast %cst_13 : f32 to vector<8x32xf32>
    %21 = arith.mulf %20, %19 : vector<8x32xf32>
    %22 = math.tanh %21 : vector<8x32xf32>
    %cst_14 = arith.constant 5.000000e-01 : f32
    %23 = vector.broadcast %cst_14 : f32 to vector<8x32xf32>
    %24 = arith.mulf %23, %22 : vector<8x32xf32>
    %cst_15 = arith.constant 5.000000e-01 : f32
    %25 = vector.broadcast %cst_15 : f32 to vector<8x32xf32>
    %26 = arith.addf %24, %25 : vector<8x32xf32>
    %c0_16 = arith.constant 0 : index
    %c0_17 = arith.constant 0 : index
    %27 = vector.load %arg6[%c0_16, %c0_17] : memref<8x32xf32, #tpu.memory_space<vmem>>, vector<8x32xf32>
    tpu.vector_store %arg6[%c0_16, %c0_17], %26 {strides = array<i32>} : memref<8x32xf32, #tpu.memory_space<vmem>>, vector<8x32xf32>,
    return
  }
  func.func @transform_0(%arg0: i32) -> (i32, i32) {
    %c0_i32 = arith.constant 0 : i32
    %c0_i32_0 = arith.constant 0 : i32
    return %arg0, %c0_i32 : i32, i32
  }
  func.func @transform_1(%arg0: i32) -> (i32, i32) {
    %c0_i32 = arith.constant 0 : i32
    %c0_i32_0 = arith.constant 0 : i32
    %c0_i32_1 = arith.constant 0 : i32
    return %c0_i32, %c0_i32_0 : i32, i32
  }
  func.func @transform_2(%arg0: i32) -> (i32, i32) {
    %c0_i32 = arith.constant 0 : i32
    %c0_i32_0 = arith.constant 0 : i32
    %c0_i32_1 = arith.constant 0 : i32
    return %c0_i32, %c0_i32_0 : i32, i32
  }
  func.func @transform_3(%arg0: i32) -> (i32, i32) {
    %c0_i32 = arith.constant 0 : i32
    %c0_i32_0 = arith.constant 0 : i32
    %c0_i32_1 = arith.constant 0 : i32
    return %c0_i32, %c0_i32_0 : i32, i32
  }
  func.func @transform_4(%arg0: i32) -> (i32, i32) {
    %c0_i32 = arith.constant 0 : i32
    %c0_i32_0 = arith.constant 0 : i32
    %c0_i32_1 = arith.constant 0 : i32
    return %c0_i32, %c0_i32_0 : i32, i32
  }
  func.func @transform_5(%arg0: i32) -> (i32, i32) {
    %c0_i32 = arith.constant 0 : i32
    %c0_i32_0 = arith.constant 0 : i32
    return %arg0, %c0_i32 : i32, i32
  }
}

</mosaic_0001>

<bundles_post_ra>
// kernel: tpu_custom_call.1
= control target key start
LH: loop header
LB: loop body
LE: loop exit
PB: predicated region body
PF: predicated region fallthrough
CT: control target
= control target key end

     0   :  { %v308_v1 = vmov 0.0   ;;  %vm39_vm0 = vcmask 130048   ;;  %vm309_vm1 = vmmov 0   ;;  %s389_s0 = inlined_call_operand.vmem [shape: f32[8,16], index: 0, kind: input, shape index: {}]   ;;  %s390_s1 = inlined_call_operand.vmem [shape: bf16[16,128], index: 1, kind: input, shape index: {}]   ;;  %s391_s2 = inlined_call_operand.vmem [shape: f32[1,128], index: 2, kind: input, shape index: {}]   ;;  %s392_s3 = inlined_call_operand.vmem [shape: bf16[128,32], index: 3, kind: input, shape index: {}]   ;;  %s393_s4 = inlined_call_operand.vmem [shape: f32[1,32], index: 4, kind: input, shape index: {}]   ;;  %s394_s5 = inlined_call_operand.hbm [shape: f32[8,32], index: 5, kind: output, shape index: {}]  }
   0x1   :  { %v271_v0 = vld [vmem:[%s390_s1] sm:$0xff]   ;;  %242 = vmatprep.subr.bf16.mxu0 %v308_v1  ;;  %248 = vmatprep.subr.bf16.mxu1 %v308_v1  ;;  %v273_v5 = vld [vmem:[%s392_s3 + $0x8] sm:$0xff]   ;;  %v274_v6 = vld [vmem:[%s392_s3 + $0x10] sm:$0xff]  }
   0x2   :  { %v22_v2 = vld [vmem:[%s389_s0] sm:$0xff]  ;;  %243 = vmatpush3.bf16.msra.mxu0 %v271_v0  ;;  %244 = vmatprep.mubr.msk.bf16.mxu0 %vm309_vm1, %v308_v1 }
   0x3   :  { %v272_v3 = vld [vmem:[%s392_s3] sm:$0xff]   ;;  %v23_v4 = vpack.c.bf16 %v22_v2, %v22_v2  ;;  %264 = vmatprep.mubr.msk.bf16.mxu1 %vm309_vm1, %v308_v1 }
   0x4   :  { %249 = vmatpush3.bf16.msra.mxu1 %v272_v3 }
   0x5   :  { %250 = vmatprep.subr.bf16.mxu1 %v308_v1  ;;  %245 = vmatmul.mubr.msk.bf16.vlgmr.msra.gmra.mrb[0].mxu0 %vm39_vm0, %v23_v4 }
   0x8   :  { %251 = vmatpush3.bf16.msra.mxu1 %v273_v5 }
   0x9   :  { %252 = vmatprep.subr.bf16.mxu1 %v308_v1 }
   0xa   :  { %10 = vsyncpa [#allocation3], 0  ;;  %v275_v7 = vld [vmem:[%s392_s3 + $0x18] sm:$0xff]   ;;  %v276_v8 = vld [vmem:[%s392_s3 + $0x20] sm:$0xff]   ;;  %vm203_vm2 = vcmask 261120  }
   0xb   :  { %v277_v9 = vld [vmem:[%s392_s3 + $0x28] sm:$0xff]   ;;  %v278_v10 = vld [vmem:[%s392_s3 + $0x30] sm:$0xff]   ;;  %v279_v11 = vld [vmem:[%s392_s3 + $0x38] sm:$0xff]  }
   0xc   :  { %253 = vmatpush3.bf16.msra.mxu1 %v274_v6  ;;  %v219_v12 = vld [vmem:[%s391_s2] ss:$0 sm:$0xff]  ;;  %s310_s2 = smov [#allocation2]  }
   0xd   :  { %254 = vmatprep.subr.bf16.mxu1 %v308_v1  ;;  %v222_v23 = vld [vmem:[%s393_s4] ss:$0 sm:$0xff]  ;;  %s211_s3 = sshll.u32 %s310_s2, 4  ;;  %s212_s3 = int_to_ptr.vmem [resolvable:$true] %s211_s3 }
   0xe   :  { %s284_s15 = scalar_lea.vmem %s212_s3, 128  ;;  %p289_p1 = scmp.lt.s32.totalorder %s212_s3, %s212_s3 }
   0xf   :  { %p285_p0 = scmp.ne.s32.totalorder %s212_s3, %s284_s15  ;;  %p290_p2 = scmp.lt.s32.totalorder %s284_s15, %s284_s15 }
  0x10   :  { %255 = vmatpush3.bf16.msra.mxu1 %v275_v7 }
  0x11   :  { %256 = vmatprep.subr.bf16.mxu1 %v308_v1  ;;  %p291_p3 = por %p290_p2, %p289_p1 }
  0x13   :  { %p292_p4 = pnand %p291_p3, %p285_p0 }
  0x14   :  { %257 = vmatpush3.bf16.msra.mxu1 %v276_v8 }
  0x15   :  { %258 = vmatprep.subr.bf16.mxu1 %v308_v1 }
  0x18   :  { %259 = vmatpush3.bf16.msra.mxu1 %v277_v9 }
  0x19   :  { %260 = vmatprep.subr.bf16.mxu1 %v308_v1 }
  0x1c   :  { %261 = vmatpush3.bf16.msra.mxu1 %v278_v10 }
  0x1d   :  { %262 = vmatprep.subr.bf16.mxu1 %v308_v1 }
  0x20   :  { %263 = vmatpush3.bf16.msra.mxu1 %v279_v11 }
  0xd8   :  { %v77_v13 = vpop.f32.mrb[0].mxu0 }
  0xd9   :  { %v78_v14 = vadd.f32 %v219_v12, %v77_v13  ;;  %v246_v15 = vpop.f32.mrb[1].mxu0 }
  0xda   :  { %v80_v16 = vpop.f32.mrb[2].mxu0 }
  0xdb   :  { %v83_v17 = vmul.f32 0.5, %v78_v14  ;;  %v247_v18 = vpop.f32.mrb[3].mxu0 }
  0xdd   :  { %280 = vtanh.f32 %v83_v17 }
  0xe7   :  { %v281_v19 = vpop.eup %280 }
  0xe8   :  { %v85_v20 = vmul.f32 0.5, %v281_v19 }
  0xea   :  { %v86_v21 = vadd.f32 0.5, %v85_v20 }
  0xec   :  { %v87_v22 = vpack.c.bf16 %v86_v21, %v86_v21 }
  0xee   :  { %265 = vmatmul.mubr.bf16.vlgmr.msra.gmra.mrb[0].mxu1 %v87_v22 }
 0x1c1   :  { %v193_v24 = vpop.f32.mrb[0].mxu1 }
 0x1c2   :  { %v194_v25 = vadd.f32 %v222_v23, %v193_v24  ;;  %v266_v26 = vpop.f32.mrb[1].mxu1 }
 0x1c3   :  { %v196_v27 = vpop.f32.mrb[2].mxu1 }
 0x1c4   :  { %v199_v28 = vmul.f32 0.5, %v194_v25  ;;  %v267_v29 = vpop.f32.mrb[3].mxu1 }
 0x1c6   :  { %282 = vtanh.f32 %v199_v28 }
 0x1d0   :  { %v283_v30 = vpop.eup %282 }
 0x1d1   :  { %v201_v31 = vmul.f32 0.5, %v283_v30 }
 0x1d3   :  { %v202_v32 = vadd.f32 0.5, %v201_v31 }
 0x1d5   :  { %204 = vst.msk [vmem:[#allocation2] sm:$0xff] %vm203_vm2, %v202_v32 }
 0x1d6   :  { %295 = shalt.err (!%p292_p4)
}
 0x1d7   :  { %s296_s17 = scalar_lea.hbm %s394_s5, 128 }
 0x1d8   :  { %p297_p5 = scmp.ne.s32.totalorder %s394_s5, %s296_s17  ;;  %p300_p6 = scmp.lt.u32.totalorder %s296_s17, %s394_s5 }
 0x1da   :  { %p302_p7 = pnand %p300_p6, %p297_p5 }
 0x1dc   :  { %305 = shalt.err (!%p302_p7)
}
 0x1dd   :  { %214 = dma.vmem_to_hbm [thread:$0]  %s212_s3, 128, %s394_s5, [#allocation3]  }
 0x1de   :  { %306 = dma.done.wait [#allocation3], 128  }
 0x1df   :  { %307 = vsyncadd [#allocation3], 4294967168 }
 0x1e0   :  { %218 = vsyncpa [#allocation3], 1 }

</bundles_post_ra>
